<compile_context>
chip_gen: v7x
topology: tpu7x:2x2x1
jax: 0.10.0
libtpu: 0.0.40
codegen_flags: <defaults>
</compile_context>

<pallas_src>
import functools
import jax
import jax.numpy as jnp
from jax import lax
from jax.experimental import pallas as pl
from jax.experimental.pallas import tpu as pltpu

EPS = 1e-6  # LayerNormalization eps


def _residual_kernel(seed_ref, ab_ref, x_ref, w_ref, b_ref, o_ref, *,
                     dropout_p: float, d_real: int, d_pad: int,
                     tm: int, tn: int, num_col_tiles: int):
    j = pl.program_id(0)   # weight-column tile (outer, weight stays resident)
    i = pl.program_id(1)   # row tile (inner)

    # ---- LayerNormalization over the real D columns (torch: unbiased std) ----
    x = x_ref[...].astype(jnp.float32)                       # (tm, d_pad)
    mean = jnp.sum(x, axis=-1, keepdims=True) * (1.0 / d_real)
    diff = x - mean
    if d_pad != d_real:
        col = lax.broadcasted_iota(jnp.int32, (tm, d_pad), 1)
        diff = jnp.where(col < d_real, diff, 0.0)            # mask zero-padding
    var = jnp.sum(diff * diff, axis=-1, keepdims=True) * (1.0 / (d_real - 1))
    inv = 1.0 / (jnp.sqrt(var) + EPS)                        # eps on std (torch)
    alpha = ab_ref[0]
    beta = ab_ref[1]
    normed = alpha * (diff * inv) + beta

    # ---- sublayer: dense projection (MXU, weight's native dtype, f32 acc) ----
    w = w_ref[...]
    y = jnp.dot(normed.astype(w.dtype), w, preferred_element_type=jnp.float32)
    y = y + b_ref[...].astype(jnp.float32)                   # (tm, tn)

    # ---- inverted dropout: counter-hash PRNG + integer threshold compare ----
    if dropout_p > 0.0:
        rows = lax.broadcasted_iota(jnp.int32, (tm, tn), 0) + i * tm
        cols = lax.broadcasted_iota(jnp.int32, (tm, tn), 1) + j * tn
        h = (rows * d_pad + cols).astype(jnp.uint32)
        h = h + seed_ref[0].astype(jnp.uint32) * jnp.uint32(0x9E3779B9)
        h = h ^ (h >> 16)
        h = h * jnp.uint32(0x7FEB352D)
        h = h ^ (h >> 15)
        h = h * jnp.uint32(0x846CA68B)
        h = h ^ (h >> 16)
        thresh = jnp.uint32(min(int(round(dropout_p * 4294967296.0)), 4294967295))
        y = jnp.where(h >= thresh, y * (1.0 / (1.0 - dropout_p)), 0.0)

    # ---- residual add ----
    if num_col_tiles == 1:
        x_res = x                                            # full row == out tile
    else:
        x_res = x_ref[:, pl.ds(j * tn, tn)].astype(jnp.float32)
    o_ref[...] = (x_res + y).astype(o_ref.dtype)


def residual_connection(x, w, b, alpha, beta, *, seed=0, dropout_p=0.1,
                        tm=None, tn=None):
    """x: [B, S, D]; w: [D, D]; b: [1, D]; alpha, beta: [1, 1] scalars.

    Pass a fresh `seed` every training step; the same seed reproduces the same
    dropout mask.  dropout_p == 0.0 gives the deterministic (eval) path.
    """
    B, S, D = x.shape
    assert D >= 2, "unbiased std needs D >= 2"
    R = B * S

    def rup(a, m):
        return -(-a // m) * m

    D_pad = rup(D, 128)                       # lane-dense output / MXU width
    if tm is None:
        tm = min(256, rup(R, 8))              # full MXU M where possible
    R_pad = rup(R, tm)                        # no silent row drop
    if tn is None:
        if D_pad <= 512:
            tn = D_pad
        else:                                 # keep only a (D_pad, tn) weight slab resident
            tn = next(t for t in (512, 384, 256, 128) if D_pad % t == 0)
    num_i = R_pad // tm
    num_j = D_pad // tn

    xf = x.reshape(R, D)
    if (R_pad, D_pad) != (R, D):
        xf = jnp.pad(xf, ((0, R_pad - R), (0, D_pad - D)))
    wp = w if D_pad == D else jnp.pad(w, ((0, D_pad - D), (0, D_pad - D)))
    bp = b if D_pad == D else jnp.pad(b, ((0, 0), (0, D_pad - D)))

    seed_arr = jnp.asarray([seed], dtype=jnp.int32)                 # SMEM
    ab = jnp.stack([alpha.reshape(()), beta.reshape(())]).astype(jnp.float32)

    kernel = functools.partial(
        _residual_kernel, dropout_p=float(dropout_p), d_real=D, d_pad=D_pad,
        tm=tm, tn=tn, num_col_tiles=num_j)

    # Rough double-buffered VMEM budget + headroom (explicit limit; v5e default
    # scoped VMEM is small, v7x physical VMEM is 64 MiB).
    need = 2 * (tm * D_pad * xf.dtype.itemsize
                + D_pad * tn * wp.dtype.itemsize
                + tn * bp.dtype.itemsize
                + tm * tn * jnp.dtype(x.dtype).itemsize)
    vmem_limit = int(min(96 * 2**20, max(32 * 2**20, 2 * need)))

    out = pl.pallas_call(
        kernel,
        out_shape=jax.ShapeDtypeStruct((R_pad, D_pad), x.dtype),
        grid_spec=pltpu.PrefetchScalarGridSpec(
            num_scalar_prefetch=2,                 # dropout seed + (alpha, beta) in SMEM
            grid=(num_j, num_i),                   # weight-column tile outer, rows inner
            in_specs=[
                pl.BlockSpec((tm, D_pad), lambda j, i, sref, abref: (i, 0)),  # x rows
                pl.BlockSpec((D_pad, tn), lambda j, i, sref, abref: (0, j)),  # weight slab
                pl.BlockSpec((1, tn),     lambda j, i, sref, abref: (0, j)),  # bias slab
            ],
            out_specs=pl.BlockSpec((tm, tn), lambda j, i, sref, abref: (i, j)),
        ),
        compiler_params=pltpu.CompilerParams(
            dimension_semantics=("parallel", "parallel"),
            vmem_limit_bytes=vmem_limit),
    )(seed_arr, ab, xf, wp, bp)

    return out[:R, :D].reshape(B, S, D)


def residual_connection_ref(x, w, b, alpha, beta):
    """Pure-JAX reference (dropout disabled) mirroring the torch module."""
    mean = jnp.mean(x, axis=-1, keepdims=True)
    std = jnp.std(x, axis=-1, keepdims=True, ddof=1)   # torch.std default (unbiased)
    normed = alpha[0, 0] * (x - mean) / (std + EPS) + beta[0, 0]
    y = normed @ w + b
    return x + y


if __name__ == "__main__":
    B, S, D = 2, 8, 32
    key = jax.random.PRNGKey(0)
    kx, kw = jax.random.split(key)

    x = jax.random.normal(kx, (B, S, D), dtype=jnp.float32)

    # Deterministic parameter init (synthetic, not a checkpoint load):
    w = jax.random.normal(kw, (D, D), dtype=jnp.float32) * (1.0 / jnp.sqrt(D))
    b = jnp.zeros((1, D), dtype=jnp.float32)
    alpha = jnp.ones((1, 1), dtype=jnp.float32)   # LayerNormalization.alpha
    beta = jnp.zeros((1, 1), dtype=jnp.float32)   # LayerNormalization.bias

    # Correctness check with dropout disabled (deterministic path).  Tolerance
    # accounts for MXU f32-matmul precision differences vs the XLA reference.
    out_nodrop = residual_connection(x, w, b, alpha, beta, seed=0, dropout_p=0.0)
    jax.block_until_ready(out_nodrop)
    ref = residual_connection_ref(x, w, b, alpha, beta)
    assert out_nodrop.shape == (B, S, D)
    assert jnp.allclose(out_nodrop, ref, atol=2e-2, rtol=2e-2), (
        float(jnp.max(jnp.abs(out_nodrop - ref))))

    # Full forward with training-mode dropout (p=0.1), as in the torch module.
    out = residual_connection(x, w, b, alpha, beta, seed=123, dropout_p=0.1)
    jax.block_until_ready(out)
    assert out.shape == (B, S, D)
    assert bool(jnp.all(jnp.isfinite(out)))

    print("KERNEL_OK")
</pallas_src>

<mosaic_0001>
module attributes {stable_mosaic.version = 11 : i64} {
  func.func @_residual_kernel(%arg0: i32, %arg1: i32, %arg2: memref<1xi32, #tpu.memory_space<smem>>, %arg3: memref<2xf32, #tpu.memory_space<smem>>, %arg4: memref<16x128xf32, #tpu.memory_space<vmem>>, %arg5: memref<128x128xf32, #tpu.memory_space<vmem>>, %arg6: memref<1x128xf32, #tpu.memory_space<vmem>>, %arg7: memref<16x128xf32, #tpu.memory_space<vmem>>) attributes {dimension_semantics = [#tpu.dimension_semantics<parallel>, #tpu.dimension_semantics<parallel>], iteration_bounds = array<i64: 1, 1>, scalar_prefetch = 2 : i64, scratch_operands = 0 : i64, tpu.core_type = #tpu.core_type<tc>, window_params = [{transform_indices = @transform_0, window_bounds = array<i64: 16, 128>}, {transform_indices = @transform_1, window_bounds = array<i64: 128, 128>}, {transform_indices = @transform_2, window_bounds = array<i64: 1, 128>}, {transform_indices = @transform_3, window_bounds = array<i64: 16, 128>}]} {
    %c0 = arith.constant 0 : index
    %c0_0 = arith.constant 0 : index
    %0 = vector.load %arg4[%c0, %c0_0] : memref<16x128xf32, #tpu.memory_space<vmem>>, vector<16x128xf32>
    %cst = arith.constant dense<0.000000e+00> : vector<16xf32>
    %1 = vector.multi_reduction <add>, %0, %cst [1] : vector<16x128xf32> to vector<16xf32>
    %2 = vector.shape_cast %1 : vector<16xf32> to vector<16x1xf32>
    %cst_1 = arith.constant 3.125000e-02 : f32
    %3 = vector.broadcast %cst_1 : f32 to vector<16x1xf32>
    %4 = arith.mulf %2, %3 : vector<16x1xf32>
    %5 = vector.broadcast %4 : vector<16x1xf32> to vector<16x128xf32>
    %6 = arith.subf %0, %5 : vector<16x128xf32>
    %7 = tpu.iota {dimensions = array<i32: 1>} : vector<16x128xi32>
    %c32_i32 = arith.constant 32 : i32
    %8 = vector.broadcast %c32_i32 : i32 to vector<16x128xi32>
    %9 = arith.cmpi slt, %7, %8 : vector<16x128xi32>
    %cst_2 = arith.constant 0.000000e+00 : f32
    %10 = vector.broadcast %cst_2 : f32 to vector<16x128xf32>
    %11 = arith.select %9, %6, %10 : vector<16x128xi1>, vector<16x128xf32>
    %12 = arith.mulf %11, %11 : vector<16x128xf32>
    %cst_3 = arith.constant dense<0.000000e+00> : vector<16xf32>
    %13 = vector.multi_reduction <add>, %12, %cst_3 [1] : vector<16x128xf32> to vector<16xf32>
    %14 = vector.shape_cast %13 : vector<16xf32> to vector<16x1xf32>
    %cst_4 = arith.constant 0.0322580636 : f32
    %15 = vector.broadcast %cst_4 : f32 to vector<16x1xf32>
    %16 = arith.mulf %14, %15 : vector<16x1xf32>
    %17 = math.sqrt %16 : vector<16x1xf32>
    %cst_5 = arith.constant 9.99999997E-7 : f32
    %18 = vector.broadcast %cst_5 : f32 to vector<16x1xf32>
    %19 = arith.addf %17, %18 : vector<16x1xf32>
    %cst_6 = arith.constant 1.000000e+00 : f32
    %20 = vector.broadcast %cst_6 : f32 to vector<16x1xf32>
    %21 = arith.divf %20, %19 : vector<16x1xf32>
    %c0_7 = arith.constant 0 : index
    %22 = memref.load %arg3[%c0_7] : memref<2xf32, #tpu.memory_space<smem>>
    %c1 = arith.constant 1 : index
    %23 = memref.load %arg3[%c1] : memref<2xf32, #tpu.memory_space<smem>>
    %24 = vector.broadcast %21 : vector<16x1xf32> to vector<16x128xf32>
    %25 = arith.mulf %11, %24 : vector<16x128xf32>
    %26 = vector.broadcast %22 : f32 to vector<16x128xf32>
    %27 = arith.mulf %26, %25 : vector<16x128xf32>
    %28 = vector.broadcast %23 : f32 to vector<16x128xf32>
    %29 = arith.addf %27, %28 : vector<16x128xf32>
    %c0_8 = arith.constant 0 : index
    %c0_9 = arith.constant 0 : index
    %30 = vector.load %arg5[%c0_8, %c0_9] : memref<128x128xf32, #tpu.memory_space<vmem>>, vector<128x128xf32>
    %cst_10 = arith.constant dense<0.000000e+00> : vector<16x128xf32>
    %31 = tpu.matmul %29, %30, %cst_10 {dimension_numbers = #tpu.dot_dimension_numbers<[1], [0], [0], [1], [0, 0, 1, 1], [], []>} : vector<16x128xf32>, vector<128x128xf32>, vector<16x128xf32> -> vector<16x128xf32>
    %c0_11 = arith.constant 0 : index
    %c0_12 = arith.constant 0 : index
    %32 = vector.load %arg6[%c0_11, %c0_12] : memref<1x128xf32, #tpu.memory_space<vmem>>, vector<1x128xf32>
    %33 = vector.broadcast %32 : vector<1x128xf32> to vector<16x128xf32>
    %34 = arith.addf %31, %33 : vector<16x128xf32>
    %35 = arith.addf %0, %34 : vector<16x128xf32>
    %c0_13 = arith.constant 0 : index
    %c0_14 = arith.constant 0 : index
    %36 = vector.load %arg7[%c0_13, %c0_14] : memref<16x128xf32, #tpu.memory_space<vmem>>, vector<16x128xf32>
    tpu.vector_store %arg7[%c0_13, %c0_14], %35 {strides = array<i32>} : memref<16x128xf32, #tpu.memory_space<vmem>>, vector<16x128xf32>,
    return
  }
  func.func @transform_0(%arg0: i32, %arg1: i32, %arg2: memref<1xi32, #tpu.memory_space<smem>>, %arg3: memref<2xf32, #tpu.memory_space<smem>>) -> (i32, i32) {
    %c0_i32 = arith.constant 0 : i32
    %c0_i32_0 = arith.constant 0 : i32
    return %arg1, %c0_i32 : i32, i32
  }
  func.func @transform_1(%arg0: i32, %arg1: i32, %arg2: memref<1xi32, #tpu.memory_space<smem>>, %arg3: memref<2xf32, #tpu.memory_space<smem>>) -> (i32, i32) {
    %c0_i32 = arith.constant 0 : i32
    %c0_i32_0 = arith.constant 0 : i32
    return %c0_i32, %arg0 : i32, i32
  }
  func.func @transform_2(%arg0: i32, %arg1: i32, %arg2: memref<1xi32, #tpu.memory_space<smem>>, %arg3: memref<2xf32, #tpu.memory_space<smem>>) -> (i32, i32) {
    %c0_i32 = arith.constant 0 : i32
    %c0_i32_0 = arith.constant 0 : i32
    return %c0_i32, %arg0 : i32, i32
  }
  func.func @transform_3(%arg0: i32, %arg1: i32, %arg2: memref<1xi32, #tpu.memory_space<smem>>, %arg3: memref<2xf32, #tpu.memory_space<smem>>) -> (i32, i32) {
    %c0_i32 = arith.constant 0 : i32
    return %arg1, %arg0 : i32, i32
  }
}

</mosaic_0001>

<bundles_post_ra>
// kernel: tpu_custom_call.1
= control target key start
LH: loop header
LB: loop body
LE: loop exit
PB: predicated region body
PF: predicated region fallthrough
CT: control target
= control target key end

     0   :  { %s519_s0 = inlined_call_operand.<no memory space> [shape: s32[1], index: 0, kind: input, shape index: {}]   ;;  %s520_s1 = inlined_call_operand.vmem [shape: f32[2], index: 1, kind: input, shape index: {}]   ;;  %s521_s2 = inlined_call_operand.hbm [shape: f32[16,128], index: 2, kind: input, shape index: {}]   ;;  %s522_s3 = inlined_call_operand.hbm [shape: f32[128,128], index: 3, kind: input, shape index: {}]   ;;  %s523_s4 = inlined_call_operand.vmem [shape: f32[1,128], index: 4, kind: input, shape index: {}]   ;;  %s524_s5 = inlined_call_operand.hbm [shape: f32[16,128], index: 5, kind: output, shape index: {}]  }
   0x1   :  { %s11_s20 = sshll.u32 %s520_s1, 4  ;;  %s12_s20 = int_to_ptr.vmem [resolvable:$true] %s11_s20 }
   0x2   :  { %s326_s0 = scalar_lea.vmem %s12_s20, 16  ;;  %p331_p1 = scmp.lt.s32.totalorder %s12_s20, %s12_s20 }
   0x3   :  { %p327_p0 = scmp.ne.s32.totalorder %s12_s20, %s326_s0  ;;  %p332_p2 = scmp.lt.s32.totalorder %s326_s0, %s326_s0 }
   0x5   :  { %p333_p3 = por %p332_p2, %p331_p1 }
   0x7   :  { %p334_p4 = pnand %p333_p3, %p327_p0 }
   0x9   :  { %337 = shalt.err (!%p334_p4)  }
   0xa   :  { %s412_s21 = smov [#allocation4]  }
   0xb   :  { %14 = dma.vmem_to_smem %s12_s20, 16, %s412_s21, [#allocation2] }
   0xc   :  { %404 = dma.done.wait [#allocation2], 16 }
   0xd   :  { %405 = vsyncadd [#allocation2], 4294967280 }
   0xe   :  { %16 = sfence }
   0xf   :  { %17 = vsyncpa [#allocation6], 0 }
  0x10   :  { %18 = vsyncpa [#allocation9], 0 }
  0x11   :  { %19 = vsyncpa [#allocation7], 0  ;;  %s413_s22 = smov [#allocation5]   ;;  %s338_s25 = scalar_lea.hbm %s521_s2, 256 }
  0x12   :  { %s25_s23 = sshll.u32 %s413_s22, 4  ;;  %p339_p5 = scmp.ne.s32.totalorder %s521_s2, %s338_s25  ;;  %s26_s23 = int_to_ptr.vmem [resolvable:$true] %s25_s23 }
  0x13   :  { %p342_p6 = scmp.lt.u32.totalorder %s338_s25, %s521_s2 }
  0x15   :  { %p344_p7 = pnand %p342_p6, %p339_p5 }
  0x17   :  { %347 = shalt.err (!%p344_p7)
}
  0x18   :  { %s348_s30 = scalar_lea.vmem %s26_s23, 256  ;;  %p353_p9 = scmp.lt.s32.totalorder %s26_s23, %s26_s23 }
  0x19   :  { %p349_p8 = scmp.ne.s32.totalorder %s26_s23, %s348_s30  ;;  %p354_p10 = scmp.lt.s32.totalorder %s348_s30, %s348_s30 }
  0x1b   :  { %p355_p11 = por %p354_p10, %p353_p9 }
  0x1d   :  { %p356_p12 = pnand %p355_p11, %p349_p8 }
  0x1f   :  { %359 = shalt.err (!%p356_p12)
}
  0x20   :  { %s414_s6 = smov 128   ;;  %s415_s7 = smov 8  }
  0x21   :  { %31 = dma.hbm_to_vmem [thread:$0]  %s521_s2, 256, %s26_s23, [#allocation6], %s414_s6, %s414_s6, %s415_s7  }
  0x22   :  { %s416_s10 = smov [#allocation8]   ;;  %s360_s14 = scalar_lea.hbm %s522_s3, 2048 }
  0x23   :  { %s37_s11 = sshll.u32 %s416_s10, 4  ;;  %p361_p13 = scmp.ne.s32.totalorder %s522_s3, %s360_s14  ;;  %s38_s11 = int_to_ptr.vmem [resolvable:$true] %s37_s11 }
  0x24   :  { %p364_p0 = scmp.lt.u32.totalorder %s360_s14, %s522_s3 }
  0x26   :  { %p366_p1 = pnand %p364_p0, %p361_p13 }
  0x28   :  { %369 = shalt.err (!%p366_p1)
}
  0x29   :  { %s370_s19 = scalar_lea.vmem %s38_s11, 2048  ;;  %p375_p3 = scmp.lt.s32.totalorder %s38_s11, %s38_s11 }
  0x2a   :  { %p371_p2 = scmp.ne.s32.totalorder %s38_s11, %s370_s19  ;;  %p376_p4 = scmp.lt.s32.totalorder %s370_s19, %s370_s19 }
  0x2c   :  { %p377_p5 = por %p376_p4, %p375_p3 }
  0x2e   :  { %p378_p6 = pnand %p377_p5, %p371_p2 }
  0x30   :  { %381 = shalt.err (!%p378_p6)
}
  0x31   :  { %43 = dma.hbm_to_vmem [thread:$0]  %s522_s3, 2048, %s38_s11, [#allocation9], %s414_s6, %s414_s6, %s415_s7  }
  0x32   :  { %406 = dma.done.wait [#allocation6], 256  }
  0x33   :  { %407 = vsyncadd [#allocation6], 4294967040 }
  0x34   :  { %408 = dma.done.wait [#allocation9], 2048  }
  0x35   :  { %409 = vsyncadd [#allocation9], 4294965248  ;;  %v481_v0 = vld [vmem:[#allocation5] sm:$0xff]  ;;  %v484_v1 = vld [vmem:[#allocation5 + $0x8] sm:$0xff]  ;;  %v62_v2 = vlaneseq  ;;  %s95_s3 = sld [smem:[#allocation4]]  ;;  %s225_s0 = sld [smem:[#allocation4 + $0x1]] }
  0x36   :  { %54 = vadd.xlane.f32.xlu0 %v481_v0  ;;  %v105_v14 = vld [vmem:[#allocation8] sm:$0xff]  ;;  %v106_v15 = vld [vmem:[#allocation8 + $0x8] sm:$0xff]  ;;  %v107_v17 = vld [vmem:[#allocation8 + $0x10] sm:$0xff]  ;;  %s417_s23 = smov [#allocation10]  }
  0x37   :  { %v63_v3 = vand.u32 127, %v62_v2  ;;  %v280_v16 = vpack.c.bf16 %v106_v15, %v105_v14  ;;  %v108_v18 = vld [vmem:[#allocation8 + $0x18] sm:$0xff]  ;;  %v109_v20 = vld [vmem:[#allocation8 + $0x20] sm:$0xff]  ;;  %v110_v21 = vld [vmem:[#allocation8 + $0x28] sm:$0xff]  ;;  %s212_s1 = sshll.u32 %s417_s23, 4  ;;  %s213_s1 = int_to_ptr.vmem [resolvable:$true] %s212_s1 }
  0x38   :  { %v284_v19 = vpack.c.bf16 %v108_v18, %v107_v17  ;;  %v288_v22 = vpack.c.bf16 %v110_v21, %v109_v20  ;;  %v111_v23 = vld [vmem:[#allocation8 + $0x30] sm:$0xff]  ;;  %v112_v24 = vld [vmem:[#allocation8 + $0x38] sm:$0xff]  ;;  %v113_v26 = vld [vmem:[#allocation8 + $0x40] sm:$0xff]  ;;  %s382_s24 = scalar_lea.vmem %s213_s1, 256  ;;  %p387_p8 = scmp.lt.s32.totalorder %s213_s1, %s213_s1 }
  0x39   :  { %vm64_vm0 = vcmp.lt.s32.totalorder %v63_v3, 32  ;;  %281 = vmatprep.subr.bf16.mxu0 %v280_v16  ;;  %v292_v25 = vpack.c.bf16 %v112_v24, %v111_v23  ;;  %v114_v27 = vld [vmem:[#allocation8 + $0x48] sm:$0xff]  ;;  %v115_v28 = vld [vmem:[#allocation8 + $0x50] sm:$0xff]  ;;  %v116_v30 = vld [vmem:[#allocation8 + $0x58] sm:$0xff]  ;;  %p383_p7 = scmp.ne.s32.totalorder %s213_s1, %s382_s24  ;;  %p388_p9 = scmp.lt.s32.totalorder %s382_s24, %s382_s24 }
  0x3a   :  { %56 = vadd.xlane.f32.xlu0 %v484_v1  ;;  %283 = vmatpush3.bf16.msra.mxu0 %v280_v16  ;;  %v296_v29 = vpack.c.bf16 %v114_v27, %v113_v26  ;;  %v300_v31 = vpack.c.bf16 %v116_v30, %v115_v28  ;;  %v117_v32 = vld [vmem:[#allocation8 + $0x60] sm:$0xff]  ;;  %v118_v33 = vld [vmem:[#allocation8 + $0x68] sm:$0xff]  ;;  %v119_v35 = vld [vmem:[#allocation8 + $0x70] sm:$0xff] }
  0x3b   :  { %285 = vmatprep.subr.bf16.mxu0 %v284_v19  ;;  %v304_v34 = vpack.c.bf16 %v118_v33, %v117_v32  ;;  %v120_v36 = vld [vmem:[#allocation8 + $0x78] sm:$0xff]  ;;  %v99_v55 = vstv %s95_s3  ;;  %v102_v57 = vstv %s225_s0  ;;  %v226_v2 = vld [vmem:[%s523_s4] ss:$0 sm:$0xff]  ;;  %p389_p10 = por %p388_p9, %p387_p8 }
  0x3c   :  { %v308_v37 = vpack.c.bf16 %v120_v36, %v119_v35 }
  0x3d   :  { %p390_p11 = pnand %p389_p10, %p383_p7 }
  0x3e   :  { %287 = vmatpush3.bf16.msra.mxu0 %v284_v19 }
  0x3f   :  { %289 = vmatprep.subr.bf16.mxu0 %v288_v22 }
  0x42   :  { %291 = vmatpush3.bf16.msra.mxu0 %v288_v22 }
  0x43   :  { %293 = vmatprep.subr.bf16.mxu0 %v292_v25 }
  0x46   :  { %295 = vmatpush3.bf16.msra.mxu0 %v292_v25 }
  0x47   :  { %297 = vmatprep.subr.bf16.mxu0 %v296_v29 }
  0x4a   :  { %299 = vmatpush3.bf16.msra.mxu0 %v296_v29 }
  0x4b   :  { %301 = vmatprep.subr.bf16.mxu0 %v300_v31 }
  0x4e   :  { %303 = vmatpush3.bf16.msra.mxu0 %v300_v31 }
  0x4f   :  { %305 = vmatprep.subr.bf16.mxu0 %v304_v34 }
  0x52   :  { %307 = vmatpush3.bf16.msra.mxu0 %v304_v34 }
  0x53   :  { %309 = vmatprep.subr.bf16.mxu0 %v308_v37 }
  0x56   :  { %311 = vmatpush3.bf16.msra.mxu0 %v308_v37 }
  0xc3   :  { %v55_v4 = vpop.xlane.xlu0 %54 }
  0xc4   :  { %v58_v5 = vmul.f32 0.03125, %v55_v4 }
  0xc6   :  { %v60_v6 = vsub.f32 %v481_v0, %v58_v5 }
  0xc7   :  { %v57_v7 = vpop.xlane.xlu0 %56 }
  0xc8   :  { %v59_v8 = vmul.f32 0.03125, %v57_v7  ;;  %v488_v9 = vsel %vm64_vm0, %v60_v6, 0.0 }
  0xc9   :  { %v67_v10 = vmul.f32 %v488_v9, %v488_v9 }
  0xca   :  { %v61_v11 = vsub.f32 %v484_v1, %v59_v8 }
  0xcb   :  { %69 = vadd.xlane.f32.xlu1 %v67_v10 }
  0xcc   :  { %v493_v12 = vsel %vm64_vm0, %v61_v11, 0.0 }
  0xcd   :  { %v68_v13 = vmul.f32 %v493_v12, %v493_v12 }
  0xcf   :  { %71 = vadd.xlane.f32.xlu1 %v68_v13 }
 0x158   :  { %v70_v38 = vpop.xlane.xlu1 %69 }
 0x159   :  { %v73_v39 = vmul.f32 0.032258064, %v70_v38 }
 0x15b   :  { %318 = vrsqrt.f32 %v73_v39  ;;  %vm77_vm1 = vcmp.eq.f32.partialorder %v73_v39, inf  ;;  %v80_v44 = vand.u32 2147483648, %v73_v39  ;;  %vm79_vm2 = vcmp.eq.f32.partialorder %v73_v39, 0.0 }
 0x15c   :  { %v72_v40 = vpop.xlane.xlu1 %71 }
 0x15d   :  { %v74_v41 = vmul.f32 0.032258064, %v72_v40 }
 0x15f   :  { %320 = vrsqrt.f32 %v74_v41  ;;  %vm84_vm3 = vcmp.eq.f32.partialorder %v74_v41, inf  ;;  %v87_v50 = vand.u32 2147483648, %v74_v41  ;;  %vm86_vm4 = vcmp.eq.f32.partialorder %v74_v41, 0.0 }
 0x165   :  { %v319_v42 = vpop.eup %318 }
 0x166   :  { %v76_v43 = vmul.f32 %v319_v42, %v73_v39 }
 0x168   :  { %v78_v45 = vsel %vm77_vm1, %v73_v39, %v76_v43 }
 0x169   :  { %v321_v46 = vpop.eup %320  ;;  %v81_v47 = vsel %vm79_vm2, %v80_v44, %v78_v45 }
 0x16a   :  { %v83_v48 = vmul.f32 %v321_v46, %v74_v41  ;;  %v89_v49 = vadd.f32 1e-06, %v81_v47 }
 0x16c   :  { %v85_v51 = vsel %vm84_vm3, %v74_v41, %v83_v48  ;;  %322 = vrcp.f32 %v89_v49 }
 0x16d   :  { %v88_v52 = vsel %vm86_vm4, %v87_v50, %v85_v51 }
 0x16e   :  { %v90_v53 = vadd.f32 1e-06, %v88_v52 }
 0x170   :  { %324 = vrcp.f32 %v90_v53 }
 0x176   :  { %v323_v54 = vpop.eup %322 }
 0x177   :  { %v97_v56 = vmul.f32 %v323_v54, %v488_v9 }
 0x179   :  { %v100_v58 = vmul.f32 %v99_v55, %v97_v56 }
 0x17a   :  { %v325_v59 = vpop.eup %324 }
 0x17b   :  { %v98_v60 = vmul.f32 %v325_v59, %v493_v12  ;;  %v103_v61 = vadd.f32 %v102_v57, %v100_v58 }
 0x17d   :  { %v101_v62 = vmul.f32 %v99_v55, %v98_v60  ;;  %277 = vmatprep.mubr.f32.mxu0 %v103_v61 }
 0x17f   :  { %v104_v63 = vadd.f32 %v102_v57, %v101_v62 }
 0x181   :  { %278 = vmatmul.mubr.f32.vlgmr.msra.gmra.mrb[0].mxu0 %v104_v63 }
 0x254   :  { %v279_v3 = vpop.f32.mrb[0].mxu0 }
 0x255   :  { %v200_v4 = vadd.f32 %v279_v3, %v226_v2  ;;  %v194_v5 = vpop.f32.mrb[1].mxu0 }
 0x256   :  { %v195_v6 = vadd.f32 %v226_v2, %v194_v5 }
 0x257   :  { %v204_v7 = vadd.f32 %v200_v4, %v484_v1 }
 0x258   :  { %v203_v8 = vadd.f32 %v195_v6, %v481_v0 }
 0x259   :  { %206 = vst [vmem:[#allocation10 + $0x8] sm:$0xff] %v204_v7 }
 0x25a   :  { %205 = vst [vmem:[#allocation10] sm:$0xff] %v203_v8 }
 0x25b   :  { %393 = shalt.err (!%p390_p11)
}
 0x25c   :  { %s394_s26 = scalar_lea.hbm %s524_s5, 256 }
 0x25d   :  { %p395_p12 = scmp.ne.s32.totalorder %s524_s5, %s394_s26  ;;  %p398_p13 = scmp.lt.u32.totalorder %s394_s26, %s524_s5 }
 0x25f   :  { %p400_p0 = pnand %p398_p13, %p395_p12 }
 0x261   :  { %403 = shalt.err (!%p400_p0)
}
 0x262   :  { %218 = dma.vmem_to_hbm [thread:$0]  %s213_s1, 256, %s524_s5, [#allocation7], %s414_s6, %s414_s6, %s415_s7  }
 0x263   :  { %410 = dma.done.wait [#allocation7], 256  }
 0x264   :  { %411 = vsyncadd [#allocation7], 4294967040 }
 0x265   :  { %222 = vsyncpa [#allocation6], 1 }
 0x266   :  { %223 = vsyncpa [#allocation9], 1 }
 0x267   :  { %224 = vsyncpa [#allocation7], 1 }

</bundles_post_ra>
